<compile_context>
chip_gen: v6e
topology: v6e:2x2x1
jax: 0.10.0
libtpu: 0.0.40
codegen_flags: <defaults>
</compile_context>

<pallas_src>
import functools

import jax
import jax.numpy as jnp
from jax.experimental import pallas as pl
from jax.experimental.pallas import tpu as pltpu


SMALL_BATCH = 512   # single-block fast path threshold
ROWS_MAX = 1024     # row-tile cap for the streamed path (multiple of 512)


def _round_up(n, m):
    return ((n + m - 1) // m) * m


def iris_mlp_kernel(x_ref, w1_ref, b1_ref, w2_ref, b2_ref, w3_ref, b3_ref, out_ref):
    """One (rows, 4) batch tile -> (rows, 3) class probabilities.

    Batch-major: batch rows on the sublane axis, features/classes on lanes.
    Weights are pre-transposed to (in, out) bf16; biases are (1, out) f32.
    Padded batch rows (zeros) produce harmless finite values that the wrapper
    slices off -- do not reduce over the batch axis here.
    """
    x = x_ref[...]                                                        # (rows, 4) bf16

    h1 = jnp.dot(x, w1_ref[...], preferred_element_type=jnp.float32) + b1_ref[...]
    h1 = jnp.maximum(h1, 0.0).astype(jnp.bfloat16)                        # (rows, 16)

    h2 = jnp.dot(h1, w2_ref[...], preferred_element_type=jnp.float32) + b2_ref[...]
    h2 = jnp.maximum(h2, 0.0).astype(jnp.bfloat16)                        # (rows, 8)

    logits = (jnp.dot(h2, w3_ref[...], preferred_element_type=jnp.float32)
              + b3_ref[...])                                              # (rows, 3) f32

    # softmax over the class axis (last axis == torch dim=1)
    m = jnp.max(logits, axis=-1, keepdims=True)
    e = jnp.exp(logits - m)
    s = jnp.sum(e, axis=-1, keepdims=True)
    out_ref[...] = (e * pl.reciprocal(s, approx=False)).astype(out_ref.dtype)


@functools.partial(jax.jit, static_argnames=())
def iris_forward(x, params):
    """x: (B, 4) float32 (PyTorch layout). Returns (B, 3) class probabilities."""
    w1, b1, w2, b2, w3, b3 = params
    B = x.shape[0]

    # Kernel-ready parameters (tiny, one-time): (in, out) bf16 weights, (1, out) f32 biases.
    w1t = w1.T.astype(jnp.bfloat16)
    w2t = w2.T.astype(jnp.bfloat16)
    w3t = w3.T.astype(jnp.bfloat16)
    b1r = b1.reshape(1, -1).astype(jnp.float32)
    b2r = b2.reshape(1, -1).astype(jnp.float32)
    b3r = b3.reshape(1, -1).astype(jnp.float32)

    if B <= SMALL_BATCH:
        # Single full-array block: no padding, no transposes, no extra HBM passes.
        rows, n_tiles, b_pad = B, 1, B
        x_in = x.astype(jnp.bfloat16)
    else:
        # >= 2 tiles (feeds both v7x TensorCores), multiple of 512 (v5e MXU),
        # capped at 1024 rows.  pad + bf16 cast fuse into a single XLA pass.
        rows = min(ROWS_MAX, _round_up(pl.cdiv(B, 2), 512))
        n_tiles = pl.cdiv(B, rows)
        b_pad = n_tiles * rows
        x_in = jnp.pad(x, ((0, b_pad - B), (0, 0))).astype(jnp.bfloat16)

    def resident(arr):
        # Full-array block, constant index_map -> DMA'd once, stays in VMEM.
        return pl.BlockSpec(arr.shape, lambda i: (0, 0))

    out = pl.pallas_call(
        iris_mlp_kernel,
        out_shape=jax.ShapeDtypeStruct((b_pad, 3), jnp.float32),
        grid=(n_tiles,),
        in_specs=[
            pl.BlockSpec((rows, 4), lambda i: (i, 0)),   # streamed, double-buffered x tiles
            resident(w1t), resident(b1r),
            resident(w2t), resident(b2r),
            resident(w3t), resident(b3r),
        ],
        out_specs=pl.BlockSpec((rows, 3), lambda i: (i, 0)),
        compiler_params=pltpu.CompilerParams(
            dimension_semantics=("parallel",)),          # batch tiles shard across TCs on v7x
    )(x_in, w1t, b1r, w2t, b2r, w3t, b3r)

    return out if b_pad == B else out[:B]


def init_params(key):
    """PyTorch nn.Linear-layout parameters: weight (out, in), bias (out,)."""
    k1, k2, k3, k4, k5, k6 = jax.random.split(key, 6)

    def uinit(k, fan_in, shape):
        bound = 1.0 / jnp.sqrt(fan_in)
        return jax.random.uniform(k, shape, jnp.float32, -bound, bound)

    w1 = uinit(k1, 4, (16, 4))
    b1 = uinit(k2, 4, (16,))
    w2 = uinit(k3, 16, (8, 16))
    b2 = uinit(k4, 16, (8,))
    w3 = uinit(k5, 8, (3, 8))
    b3 = uinit(k6, 8, (3,))
    return (w1, b1, w2, b2, w3, b3)


def iris_reference(x, params, dtype=jnp.float32):
    """Pure-JAX reference. dtype=bfloat16 mirrors the kernel's streamed precision."""
    w1, b1, w2, b2, w3, b3 = params
    c = lambda a: a.astype(dtype).astype(jnp.float32)
    h1 = jnp.maximum(c(x) @ c(w1).T + b1, 0.0)
    h2 = jnp.maximum(c(h1) @ c(w2).T + b2, 0.0)
    logits = c(h2) @ c(w3).T + b3
    return jax.nn.softmax(logits, axis=1)


if __name__ == "__main__":
    key = jax.random.PRNGKey(0)
    kx, kp = jax.random.split(key)
    params = init_params(kp)

    # Small shape consistent with the module: Iris has 4 standardized features.
    batch, features = 8, 4
    x = jax.random.normal(kx, (batch, features), jnp.float32)

    out = jax.block_until_ready(iris_forward(x, params))
    assert out.shape == (batch, 3)
    assert jnp.allclose(jnp.sum(out, axis=1), 1.0, atol=2e-3)
    # Tight check vs a reference with the same bf16 streaming precision,
    # loose check vs the pure-f32 PyTorch-equivalent math.
    assert jnp.allclose(out, iris_reference(x, params, jnp.bfloat16), atol=2e-3, rtol=2e-3)
    assert jnp.allclose(out, iris_reference(x, params), atol=5e-2, rtol=5e-2)

    # Exercise the multi-tile streamed path (grid=2, padded tail, megacore semantics).
    x_big = jax.random.normal(kx, (600, features), jnp.float32)
    out_big = jax.block_until_ready(iris_forward(x_big, params))
    assert out_big.shape == (600, 3)
    assert jnp.allclose(jnp.sum(out_big, axis=1), 1.0, atol=2e-3)
    assert jnp.allclose(out_big, iris_reference(x_big, params, jnp.bfloat16), atol=2e-3, rtol=2e-3)
    assert jnp.allclose(out_big, iris_reference(x_big, params), atol=5e-2, rtol=5e-2)

    print("KERNEL_OK")
</pallas_src>

<mosaic_0001>
module attributes {stable_mosaic.version = 11 : i64} {
  func.func @iris_mlp_kernel(%arg0: i32, %arg1: memref<8x4xbf16, #tpu.memory_space<vmem>>, %arg2: memref<4x16xbf16, #tpu.memory_space<vmem>>, %arg3: memref<1x16xf32, #tpu.memory_space<vmem>>, %arg4: memref<16x8xbf16, #tpu.memory_space<vmem>>, %arg5: memref<1x8xf32, #tpu.memory_space<vmem>>, %arg6: memref<8x3xbf16, #tpu.memory_space<vmem>>, %arg7: memref<1x3xf32, #tpu.memory_space<vmem>>, %arg8: memref<8x3xf32, #tpu.memory_space<vmem>>) attributes {dimension_semantics = [#tpu.dimension_semantics<parallel>], iteration_bounds = array<i64: 1>, scalar_prefetch = 0 : i64, scratch_operands = 0 : i64, tpu.core_type = #tpu.core_type<tc>, window_params = [{transform_indices = @transform_0, window_bounds = array<i64: 8, 4>}, {pipeline_mode = #tpu.pipeline_mode<synchronous>, transform_indices = @transform_1, window_bounds = array<i64: 4, 16>}, {pipeline_mode = #tpu.pipeline_mode<synchronous>, transform_indices = @transform_2, window_bounds = array<i64: 1, 16>}, {pipeline_mode = #tpu.pipeline_mode<synchronous>, transform_indices = @transform_3, window_bounds = array<i64: 16, 8>}, {pipeline_mode = #tpu.pipeline_mode<synchronous>, transform_indices = @transform_4, window_bounds = array<i64: 1, 8>}, {pipeline_mode = #tpu.pipeline_mode<synchronous>, transform_indices = @transform_5, window_bounds = array<i64: 8, 3>}, {pipeline_mode = #tpu.pipeline_mode<synchronous>, transform_indices = @transform_6, window_bounds = array<i64: 1, 3>}, {transform_indices = @transform_7, window_bounds = array<i64: 8, 3>}]} {
    %c0 = arith.constant 0 : index
    %c0_0 = arith.constant 0 : index
    %0 = vector.load %arg1[%c0, %c0_0] : memref<8x4xbf16, #tpu.memory_space<vmem>>, vector<8x4xbf16>
    %c0_1 = arith.constant 0 : index
    %c0_2 = arith.constant 0 : index
    %1 = vector.load %arg2[%c0_1, %c0_2] : memref<4x16xbf16, #tpu.memory_space<vmem>>, vector<4x16xbf16>
    %cst = arith.constant dense<0.000000e+00> : vector<8x16xf32>
    %2 = tpu.matmul %0, %1, %cst {dimension_numbers = #tpu.dot_dimension_numbers<[1], [0], [0], [1], [0, 0, 1, 1], [], []>} : vector<8x4xbf16>, vector<4x16xbf16>, vector<8x16xf32> -> vector<8x16xf32>
    %c0_3 = arith.constant 0 : index
    %c0_4 = arith.constant 0 : index
    %3 = vector.load %arg3[%c0_3, %c0_4] : memref<1x16xf32, #tpu.memory_space<vmem>>, vector<1x16xf32>
    %4 = vector.broadcast %3 : vector<1x16xf32> to vector<8x16xf32>
    %5 = arith.addf %2, %4 : vector<8x16xf32>
    %cst_5 = arith.constant 0.000000e+00 : f32
    %6 = vector.broadcast %cst_5 : f32 to vector<8x16xf32>
    %7 = arith.maximumf %5, %6 : vector<8x16xf32>
    %8 = arith.truncf %7 : vector<8x16xf32> to vector<8x16xbf16>
    %c0_6 = arith.constant 0 : index
    %c0_7 = arith.constant 0 : index
    %9 = vector.load %arg4[%c0_6, %c0_7] : memref<16x8xbf16, #tpu.memory_space<vmem>>, vector<16x8xbf16>
    %cst_8 = arith.constant dense<0.000000e+00> : vector<8x8xf32>
    %10 = tpu.matmul %8, %9, %cst_8 {dimension_numbers = #tpu.dot_dimension_numbers<[1], [0], [0], [1], [0, 0, 1, 1], [], []>} : vector<8x16xbf16>, vector<16x8xbf16>, vector<8x8xf32> -> vector<8x8xf32>
    %c0_9 = arith.constant 0 : index
    %c0_10 = arith.constant 0 : index
    %11 = vector.load %arg5[%c0_9, %c0_10] : memref<1x8xf32, #tpu.memory_space<vmem>>, vector<1x8xf32>
    %12 = vector.broadcast %11 : vector<1x8xf32> to vector<8x8xf32>
    %13 = arith.addf %10, %12 : vector<8x8xf32>
    %cst_11 = arith.constant 0.000000e+00 : f32
    %14 = vector.broadcast %cst_11 : f32 to vector<8x8xf32>
    %15 = arith.maximumf %13, %14 : vector<8x8xf32>
    %16 = arith.truncf %15 : vector<8x8xf32> to vector<8x8xbf16>
    %c0_12 = arith.constant 0 : index
    %c0_13 = arith.constant 0 : index
    %17 = vector.load %arg6[%c0_12, %c0_13] : memref<8x3xbf16, #tpu.memory_space<vmem>>, vector<8x3xbf16>
    %cst_14 = arith.constant dense<0.000000e+00> : vector<8x3xf32>
    %18 = tpu.matmul %16, %17, %cst_14 {dimension_numbers = #tpu.dot_dimension_numbers<[1], [0], [0], [1], [0, 0, 1, 1], [], []>} : vector<8x8xbf16>, vector<8x3xbf16>, vector<8x3xf32> -> vector<8x3xf32>
    %c0_15 = arith.constant 0 : index
    %c0_16 = arith.constant 0 : index
    %19 = vector.load %arg7[%c0_15, %c0_16] : memref<1x3xf32, #tpu.memory_space<vmem>>, vector<1x3xf32>
    %20 = vector.broadcast %19 : vector<1x3xf32> to vector<8x3xf32>
    %21 = arith.addf %18, %20 : vector<8x3xf32>
    %cst_17 = arith.constant dense<0xFF800000> : vector<8xf32>
    %22 = vector.multi_reduction <maximumf>, %21, %cst_17 [1] : vector<8x3xf32> to vector<8xf32>
    %23 = vector.shape_cast %22 : vector<8xf32> to vector<8x1xf32>
    %24 = vector.broadcast %23 : vector<8x1xf32> to vector<8x3xf32>
    %25 = arith.subf %21, %24 : vector<8x3xf32>
    %26 = math.exp %25 : vector<8x3xf32>
    %cst_18 = arith.constant dense<0.000000e+00> : vector<8xf32>
    %27 = vector.multi_reduction <add>, %26, %cst_18 [1] : vector<8x3xf32> to vector<8xf32>
    %28 = vector.shape_cast %27 : vector<8xf32> to vector<8x1xf32>
    %29 = tpu.reciprocal %28 : vector<8x1xf32> -> vector<8x1xf32>
    %30 = vector.broadcast %29 : vector<8x1xf32> to vector<8x3xf32>
    %31 = arith.mulf %26, %30 : vector<8x3xf32>
    %c0_19 = arith.constant 0 : index
    %c0_20 = arith.constant 0 : index
    %32 = vector.load %arg8[%c0_19, %c0_20] : memref<8x3xf32, #tpu.memory_space<vmem>>, vector<8x3xf32>
    tpu.vector_store %arg8[%c0_19, %c0_20], %31 {strides = array<i32>} : memref<8x3xf32, #tpu.memory_space<vmem>>, vector<8x3xf32>,
    return
  }
  func.func @transform_0(%arg0: i32) -> (i32, i32) {
    %c0_i32 = arith.constant 0 : i32
    %c0_i32_0 = arith.constant 0 : i32
    return %arg0, %c0_i32 : i32, i32
  }
  func.func @transform_1(%arg0: i32) -> (i32, i32) {
    %c0_i32 = arith.constant 0 : i32
    %c0_i32_0 = arith.constant 0 : i32
    %c0_i32_1 = arith.constant 0 : i32
    return %c0_i32, %c0_i32_0 : i32, i32
  }
  func.func @transform_2(%arg0: i32) -> (i32, i32) {
    %c0_i32 = arith.constant 0 : i32
    %c0_i32_0 = arith.constant 0 : i32
    %c0_i32_1 = arith.constant 0 : i32
    return %c0_i32, %c0_i32_0 : i32, i32
  }
  func.func @transform_3(%arg0: i32) -> (i32, i32) {
    %c0_i32 = arith.constant 0 : i32
    %c0_i32_0 = arith.constant 0 : i32
    %c0_i32_1 = arith.constant 0 : i32
    return %c0_i32, %c0_i32_0 : i32, i32
  }
  func.func @transform_4(%arg0: i32) -> (i32, i32) {
    %c0_i32 = arith.constant 0 : i32
    %c0_i32_0 = arith.constant 0 : i32
    %c0_i32_1 = arith.constant 0 : i32
    return %c0_i32, %c0_i32_0 : i32, i32
  }
  func.func @transform_5(%arg0: i32) -> (i32, i32) {
    %c0_i32 = arith.constant 0 : i32
    %c0_i32_0 = arith.constant 0 : i32
    %c0_i32_1 = arith.constant 0 : i32
    return %c0_i32, %c0_i32_0 : i32, i32
  }
  func.func @transform_6(%arg0: i32) -> (i32, i32) {
    %c0_i32 = arith.constant 0 : i32
    %c0_i32_0 = arith.constant 0 : i32
    %c0_i32_1 = arith.constant 0 : i32
    return %c0_i32, %c0_i32_0 : i32, i32
  }
  func.func @transform_7(%arg0: i32) -> (i32, i32) {
    %c0_i32 = arith.constant 0 : i32
    %c0_i32_0 = arith.constant 0 : i32
    return %arg0, %c0_i32 : i32, i32
  }
}

</mosaic_0001>

<bundles_post_ra>
// kernel: iris_forward.1
= control target key start
LH: loop header
LB: loop body
LE: loop exit
PB: predicated region body
PF: predicated region fallthrough
CT: control target
= control target key end

     0   :  { %vm40_vm0 = vcmask 1041408   ;;  %v258_v0 = vmov 0.0   ;;  %vm259_vm1 = vmmov 0   ;;  %vm36_vm2 = vcmask 31744   ;;  %s327_s1 = inlined_call_operand.vmem [shape: bf16[4,16], index: 1, kind: input, shape index: {}]   ;;  %s328_s0 = inlined_call_operand.vmem [shape: bf16[8,4], index: 0, kind: input, shape index: {}]   ;;  %s329_s3 = inlined_call_operand.vmem [shape: bf16[16,8], index: 3, kind: input, shape index: {}]   ;;  %s330_s5 = inlined_call_operand.vmem [shape: bf16[8,3], index: 5, kind: input, shape index: {}]   ;;  %s331_s2 = inlined_call_operand.vmem [shape: f32[1,16], index: 2, kind: input, shape index: {}]   ;;  %s332_s4 = inlined_call_operand.vmem [shape: f32[1,8], index: 4, kind: input, shape index: {}]   ;;  %s333_s6 = inlined_call_operand.vmem [shape: f32[1,3], index: 6, kind: input, shape index: {}]   ;;  %s334_s7 = inlined_call_operand.vmem [shape: f32[8,3], index: 7, kind: output, shape index: {}]  }
   0x1   :  { %233 = vmatprep.subr.bf16.mxu0 %v258_v0  ;;  %v28_v1 = vld [vmem:[%s327_s1] sm:$0x3]  ;;  %235 = vmatprep.mubr.msk.bf16.mxu0 %vm259_vm1, %v258_v0  ;;  %vm159_vm3 = vcmask 1043456   ;;  %vm101_vm4 = vcmask 130048   ;;  %vm155_vm5 = vcmask 64512   ;;  %vm203_vm6 = vcmask 23552  }
   0x2   :  { %v42_v2 = vsel %vm40_vm0, %v28_v1, 0  ;;  %239 = vmatprep.subr.bf16.mxu1 %v258_v0  ;;  %241 = vmatprep.mubr.msk.bf16.mxu1 %vm259_vm1, %v258_v0  ;;  %v27_v3 = vld [vmem:[%s328_s0] sm:$0xf] }
   0x3   :  { %234 = vmatpush3.bf16.msra.mxu0 %v42_v2  ;;  %v253_v4 = vld [vmem:[%s329_s3] sm:$0xff]  }
   0x4   :  { %245 = vmatprep.subr.bf16.mxu0 %v258_v0  ;;  %240 = vmatpush3.bf16.msra.mxu1 %v253_v4  ;;  %v147_v5 = vld [vmem:[%s330_s5] sm:$0xf] }
   0x5   :  { %v161_v6 = vsel %vm159_vm3, %v147_v5, 0  ;;  %v220_v7 = vld [vmem:[%s331_s2] ss:$0 sm:$0xff] }
   0x6   :  { %236 = vmatmul.mubr.msk.bf16.vlgmr.msra.gmra.mxu0 %vm36_vm2, %v27_v3  ;;  %v222_v15 = vld [vmem:[%s332_s4] ss:$0 sm:$0xff] }
   0x7   :  { %247 = vmatprep.mubr.msk.bf16.mxu0 %vm259_vm1, %v258_v0  ;;  %246 = vmatpush3.bf16.msra.mxu0 %v161_v6  ;;  %v225_v23 = vld [vmem:[%s333_s6] ss:$0 sm:$0xff] }
  0xc6   :  { %v78_v8 = vpop.f32.mrf.mxu0 }
  0xc7   :  { %v79_v9 = vadd.f32 %v220_v7, %v78_v8 }
  0xc8   :  { %v237_v10 = vpop.f32.mrf.mxu0 }
  0xc9   :  { %v84_v11 = vmax.f32 %v79_v9, 0.0 }
  0xca   :  { %v81_v12 = vpop.f32.mrf.mxu0 }
  0xcb   :  { %v85_v13 = vpack.c.bf16 %v84_v11, %v84_v11 }
  0xcc   :  { %v238_v14 = vpop.f32.mrf.mxu0 }
  0xcd   :  { %242 = vmatmul.mubr.msk.bf16.vlgmr.msra.gmra.mxu1 %vm101_vm4, %v85_v13 }
 0x18d   :  { %v139_v16 = vpop.f32.mrf.mxu1 }
 0x18e   :  { %v140_v17 = vadd.f32 %v222_v15, %v139_v16 }
 0x18f   :  { %v243_v18 = vpop.f32.mrf.mxu1 }
 0x190   :  { %v145_v19 = vmax.f32 %v140_v17, 0.0 }
 0x191   :  { %v142_v20 = vpop.f32.mrf.mxu1 }
 0x192   :  { %v146_v21 = vpack.c.bf16 %v145_v19, %v145_v19 }
 0x193   :  { %v244_v22 = vpop.f32.mrf.mxu1 }
 0x194   :  { %248 = vmatmul.mubr.msk.bf16.vlgmr.msra.gmra.mxu0 %vm155_vm5, %v146_v21 }
 0x254   :  { %v197_v24 = vpop.f32.mrf.mxu0 }
 0x255   :  { %v198_v25 = vadd.f32 %v225_v23, %v197_v24 }
 0x256   :  { %v249_v26 = vpop.f32.mrf.mxu0 }
 0x257   :  { %v204_v27 = vsel %vm203_vm6, %v198_v25, -inf }
 0x258   :  { %205 = vmax.xlane.f32.xlu0 %v204_v27  ;;  %v200_v28 = vpop.f32.mrf.mxu0 }
 0x25a   :  { %v250_v29 = vpop.f32.mrf.mxu0 }
 0x2e1   :  { %v206_v30 = vpop.xlane.xlu0 %205 }
 0x2e2   :  { %v207_v31 = vsub.f32 %v198_v25, %v206_v30 }
 0x2e4   :  { %v208_v32 = vmul.f32 1.442695, %v207_v31 }
 0x2e6   :  { %254 = vpow2.f32 %v208_v32 }
 0x2f3   :  { %v255_v33 = vpop.eup %254 }
 0x2f4   :  { %v210_v34 = vsel %vm203_vm6, %v255_v33, 0.0 }
 0x2f5   :  { %211 = vadd.xlane.f32.xlu0 %v210_v34 }
 0x37e   :  { %v212_v35 = vpop.xlane.xlu0 %211 }
 0x37f   :  { %256 = vrcp.f32 %v212_v35 }
 0x38c   :  { %v257_v36 = vpop.eup %256 }
 0x38d   :  { %v214_v37 = vmul.f32 %v257_v36, %v255_v33 }
 0x38f   :  { %215 = vst.msk [vmem:[%s334_s7] sm:$0xff] %vm203_vm6, %v214_v37 }

</bundles_post_ra>
